<compile_context>
chip_gen: v6e
topology: v6e:2x2x1
jax: 0.10.0
libtpu: 0.0.40
codegen_flags: <defaults>
</compile_context>

<pallas_src>
import functools

import jax
import jax.numpy as jnp
from jax import lax
from jax.experimental import pallas as pl
from jax.experimental.pallas import tpu as pltpu


def _rmtpp_kernel(T, Bc,
                  ts_ref, mk_ref, h0_ref,
                  Wmk_ref, wts_ref, ball_ref,
                  Whh_ref, Wsc_ref, bsc_ref,
                  score_ref, hn_ref,
                  xh_ref):
    """RMTPP hot path for one 8-row batch chunk.

    Ref shapes (rows are time-major within the chunk: row = t*Bc + b):
      ts_ref   : (T*Bc, 1)      timestamps
      mk_ref   : (T*Bc, Din)    markers
      h0_ref   : (Bc, H)        initial hidden state (num_layers == 1)
      Wmk_ref  : (Din, H)       fused  We^T @ Wih^T[1:, :]
      wts_ref  : (1, H)         Wih^T[0:1, :]   (timestamp column of W_ih)
      ball_ref : (1, H)         fused  be @ Wih^T[1:, :] + b_ih + b_hh
      Whh_ref  : (H, H)         RNN hidden weight, pre-transposed (h @ Whh)
      Wsc_ref  : (H, C_pad)     score weight, pre-transposed, zero-padded lanes
      bsc_ref  : (1, C_pad)
      score_ref: (T*Bc, C_pad)  output (lane-dense)
      hn_ref   : (Bc, H)        output (final hidden state)
      xh_ref   : (T*Bc, H)      VMEM scratch: pre-activations, then hidden states
    """
    # ---- 1) fused input projection (embed + concat + W_ih + all biases) ----
    # Written straight into VMEM scratch -> no (T*Bc, H) value live in vregs
    # across the whole unrolled recurrence.
    xh_ref[...] = (jnp.dot(mk_ref[...], Wmk_ref[...],
                           preferred_element_type=jnp.float32)
                   + ts_ref[...] * wts_ref[...]      # (T*Bc,1)*(1,H) broadcast FMA
                   + ball_ref[...])

    # ---- 2) tanh RNN recurrence; h carried in vregs, Whh hoisted ------------
    Whh = Whh_ref[...]                               # loaded once

    def step(t, h):
        rows = pl.ds(pl.multiple_of(t * Bc, Bc), Bc)   # whole (8, H) sublane tile
        h = jnp.tanh(xh_ref[rows, :]
                     + jnp.dot(h, Whh, preferred_element_type=jnp.float32))
        xh_ref[rows, :] = h                          # overwrite pre-act with h_t
        return h

    hn_ref[...] = lax.fori_loop(0, T, step, h0_ref[...], unroll=True)

    # ---- 3) score head: one batched, lane-dense matmul over all timesteps ---
    # Valid because every row of xh_ref was overwritten with a hidden state in 2).
    score_ref[...] = (jnp.dot(xh_ref[...], Wsc_ref[...],
                              preferred_element_type=jnp.float32)
                      + bsc_ref[...])


def rmtpp_forward(timestamps, markers, hidden, params):
    """PyTorch-equivalent forward.

    timestamps: (B, T, 1) f32
    markers   : (B, T, input_size) f32
    hidden    : (num_layers=1, B, H) f32
    Returns (score (B,T,C), intensity (= linear_in params, never applied), hidden (1,B,H)).
    """
    B, T, _ = timestamps.shape
    Din = markers.shape[-1]
    H = params["Whh"].shape[0]
    E = params["We"].shape[0]
    C = params["Wsc"].shape[0]
    assert 1 + E == H, "concat(timestamps, embed) must match RNN input size"

    Bc = 8                                    # sublane-aligned batch chunk
    n_chunks = pl.cdiv(B, Bc)
    B_pad = n_chunks * Bc
    C_pad = ((C + 127) // 128) * 128          # lane-dense score width
    TB = T * Bc

    # Pad batch to 8-row chunks, go time-major within each chunk, flatten to 2D.
    # Row layout: row = chunk*T*Bc + t*Bc + b_local.
    def chunk_time_major(x):                  # (B, T, D) -> (n_chunks*T*Bc, D)
        D = x.shape[-1]
        x = jnp.pad(x, ((0, B_pad - B), (0, 0), (0, 0)))
        x = x.reshape(n_chunks, Bc, T, D).transpose(0, 2, 1, 3)
        return x.reshape(n_chunks * TB, D)

    ts2 = chunk_time_major(timestamps)        # (n*T*Bc, 1)
    mk2 = chunk_time_major(markers)           # (n*T*Bc, Din)
    h0 = jnp.pad(hidden[0], ((0, B_pad - B), (0, 0)))   # (B_pad, H)

    # Fold embed Linear + concat + W_ih + all biases into fused weights (done
    # once, outside the kernel, kept in f32 HIGHEST).
    hi = lax.Precision.HIGHEST
    Wih_T = params["Wih"].T                                          # (H, H)
    wts = Wih_T[0:1, :]                                              # (1, H)
    Wih_e = Wih_T[1:, :]                                             # (E, H)
    W_mk = jnp.dot(params["We"].T, Wih_e, precision=hi)              # (Din, H)
    b_all = (jnp.dot(params["be"], Wih_e, precision=hi)
             + params["bih"] + params["bhh"])[None, :]               # (1, H)
    Whh_T = params["Whh"].T                                          # (H, H)
    # Zero-padded lanes so the padded score columns are exactly zero.
    Wsc_T = jnp.zeros((H, C_pad), jnp.float32).at[:, :C].set(params["Wsc"].T)
    bsc = jnp.zeros((1, C_pad), jnp.float32).at[:, :C].set(params["bsc"])

    kern = functools.partial(_rmtpp_kernel, T, Bc)

    score2, hn = pl.pallas_call(
        kern,
        out_shape=(
            jax.ShapeDtypeStruct((n_chunks * TB, C_pad), jnp.float32),  # score
            jax.ShapeDtypeStruct((B_pad, H), jnp.float32),              # final hidden
        ),
        grid_spec=pltpu.PrefetchScalarGridSpec(
            num_scalar_prefetch=0,
            grid=(n_chunks,),                 # independent batch chunks
            in_specs=[
                pl.BlockSpec((TB, 1), lambda c: (c, 0)),       # timestamps
                pl.BlockSpec((TB, Din), lambda c: (c, 0)),     # markers
                pl.BlockSpec((Bc, H), lambda c: (c, 0)),       # h0
                pl.BlockSpec((Din, H), lambda c: (0, 0)),      # W_mk   (resident)
                pl.BlockSpec((1, H), lambda c: (0, 0)),        # wts
                pl.BlockSpec((1, H), lambda c: (0, 0)),        # b_all
                pl.BlockSpec((H, H), lambda c: (0, 0)),        # Whh^T
                pl.BlockSpec((H, C_pad), lambda c: (0, 0)),    # Wsc^T (padded)
                pl.BlockSpec((1, C_pad), lambda c: (0, 0)),    # bsc   (padded)
            ],
            out_specs=[
                pl.BlockSpec((TB, C_pad), lambda c: (c, 0)),   # score (lane-dense)
                pl.BlockSpec((Bc, H), lambda c: (c, 0)),       # hn
            ],
            scratch_shapes=[
                pltpu.VMEM((TB, H), jnp.float32),   # per-chunk RNN pre-act / outputs
            ],
        ),
        compiler_params=pltpu.CompilerParams(
            dimension_semantics=("parallel",),       # v7x: 2 TCs split batch chunks
            # Per-core budget: chunk inputs (double-buffered) + scratch + weights
            # stay far below this; also raises v5e's 16 MiB scoped default and is
            # well under v7x's 64 MiB physical cap.
            vmem_limit_bytes=32 * 1024 * 1024,
        ),
    )(ts2, mk2, h0, W_mk, wts, b_all, Whh_T, Wsc_T, bsc)

    # Undo chunk/time-major layout, drop batch padding and padded class lanes.
    score = (score2.reshape(n_chunks, T, Bc, C_pad)
             .transpose(0, 2, 1, 3)
             .reshape(B_pad, T, C_pad)[:B, :, :C])               # (B, T, C)
    hidden_out = hn[:B][None]                                    # (1, B, H)
    # In the PyTorch code `intensity = self.linear_in` is the module object
    # itself (never applied to data); here we return its parameters.
    intensity = (params["Win"], params["bin"])
    return score, intensity, hidden_out


def _init_params(key, input_size, embed_size, hidden_size, num_classes):
    """Deterministic init mirroring PyTorch default U(-1/sqrt(fan_in), 1/sqrt(fan_in))."""
    ks = jax.random.split(key, 10)

    def u(k, shape, fan_in):
        b = 1.0 / jnp.sqrt(fan_in)
        return jax.random.uniform(k, shape, jnp.float32, -b, b)

    return dict(
        We=u(ks[0], (embed_size, input_size), input_size),       # nn.Linear weight (out, in)
        be=u(ks[1], (embed_size,), input_size),
        Wih=u(ks[2], (hidden_size, hidden_size), hidden_size),   # RNN weight_ih_l0
        bih=u(ks[3], (hidden_size,), hidden_size),
        Whh=u(ks[4], (hidden_size, hidden_size), hidden_size),   # RNN weight_hh_l0
        bhh=u(ks[5], (hidden_size,), hidden_size),
        Wsc=u(ks[6], (num_classes, hidden_size), hidden_size),   # linear_scr
        bsc=u(ks[7], (num_classes,), hidden_size),
        Win=u(ks[8], (1, hidden_size), hidden_size),             # linear_in (unused in forward)
        bin=u(ks[9], (1,), hidden_size),
    )


def _reference_forward(timestamps, markers, hidden, params):
    """Pure-JAX reference matching torch semantics (for correctness check)."""
    emb = markers @ params["We"].T + params["be"]
    x = jnp.concatenate([timestamps, emb], axis=2)               # (B, T, H)
    h = hidden[0]
    outs = []
    for t in range(x.shape[1]):
        h = jnp.tanh(x[:, t, :] @ params["Wih"].T + params["bih"]
                     + h @ params["Whh"].T + params["bhh"])
        outs.append(h)
    out = jnp.stack(outs, axis=1)                                # (B, T, H)
    score = out @ params["Wsc"].T + params["bsc"]
    return score, h[None]


if __name__ == "__main__":
    # small shapes consistent with the module: concat(1, embed) == hidden_size
    input_size, embed_size, hidden_size = 4, 31, 32
    num_layers, batch_size, num_classes = 1, 2, 5
    seq_len = 8

    key = jax.random.PRNGKey(0)
    kp, kt, km = jax.random.split(key, 3)
    params = _init_params(kp, input_size, embed_size, hidden_size, num_classes)

    timestamps = jax.random.uniform(kt, (batch_size, seq_len, 1), jnp.float32)
    markers = jax.random.normal(km, (batch_size, seq_len, input_size), jnp.float32)
    hidden = jnp.zeros((num_layers, batch_size, hidden_size), jnp.float32)  # init_hidden (broadcast batch)

    fwd = jax.jit(functools.partial(rmtpp_forward, params=params))
    score, intensity, hidden_out = fwd(timestamps, markers, hidden)
    jax.block_until_ready((score, hidden_out))

    # correctness check against pure-JAX reference (fused weights reassociate
    # f32 rounding slightly -> 1e-4 tolerance)
    score_ref, hidden_ref = _reference_forward(timestamps, markers, hidden, params)
    assert jnp.allclose(score, score_ref, atol=1e-4, rtol=1e-4), "score mismatch"
    assert jnp.allclose(hidden_out, hidden_ref, atol=1e-4, rtol=1e-4), "hidden mismatch"
    assert score.shape == (batch_size, seq_len, num_classes)
    assert hidden_out.shape == (num_layers, batch_size, hidden_size)

    print("KERNEL_OK")
</pallas_src>

<mosaic_0001>
module attributes {stable_mosaic.version = 11 : i64} {
  func.func @_rmtpp_kernel(%arg0: i32, %arg1: memref<64x1xf32, #tpu.memory_space<vmem>>, %arg2: memref<64x4xf32, #tpu.memory_space<vmem>>, %arg3: memref<8x32xf32, #tpu.memory_space<vmem>>, %arg4: memref<4x32xf32, #tpu.memory_space<vmem>>, %arg5: memref<1x32xf32, #tpu.memory_space<vmem>>, %arg6: memref<1x32xf32, #tpu.memory_space<vmem>>, %arg7: memref<32x32xf32, #tpu.memory_space<vmem>>, %arg8: memref<32x128xf32, #tpu.memory_space<vmem>>, %arg9: memref<1x128xf32, #tpu.memory_space<vmem>>, %arg10: memref<64x128xf32, #tpu.memory_space<vmem>>, %arg11: memref<8x32xf32, #tpu.memory_space<vmem>>, %arg12: memref<64x32xf32, #tpu.memory_space<vmem>>) attributes {dimension_semantics = [#tpu.dimension_semantics<parallel>], iteration_bounds = array<i64: 1>, scalar_prefetch = 0 : i64, scratch_operands = 1 : i64, tpu.core_type = #tpu.core_type<tc>, window_params = [{transform_indices = @transform_0, window_bounds = array<i64: 64, 1>}, {transform_indices = @transform_1, window_bounds = array<i64: 64, 4>}, {transform_indices = @transform_2, window_bounds = array<i64: 8, 32>}, {pipeline_mode = #tpu.pipeline_mode<synchronous>, transform_indices = @transform_3, window_bounds = array<i64: 4, 32>}, {pipeline_mode = #tpu.pipeline_mode<synchronous>, transform_indices = @transform_4, window_bounds = array<i64: 1, 32>}, {pipeline_mode = #tpu.pipeline_mode<synchronous>, transform_indices = @transform_5, window_bounds = array<i64: 1, 32>}, {pipeline_mode = #tpu.pipeline_mode<synchronous>, transform_indices = @transform_6, window_bounds = array<i64: 32, 32>}, {pipeline_mode = #tpu.pipeline_mode<synchronous>, transform_indices = @transform_7, window_bounds = array<i64: 32, 128>}, {pipeline_mode = #tpu.pipeline_mode<synchronous>, transform_indices = @transform_8, window_bounds = array<i64: 1, 128>}, {transform_indices = @transform_9, window_bounds = array<i64: 64, 128>}, {transform_indices = @transform_10, window_bounds = array<i64: 8, 32>}]} {
    %c0 = arith.constant 0 : index
    %c0_0 = arith.constant 0 : index
    %0 = vector.load %arg2[%c0, %c0_0] : memref<64x4xf32, #tpu.memory_space<vmem>>, vector<64x4xf32>
    %c0_1 = arith.constant 0 : index
    %c0_2 = arith.constant 0 : index
    %1 = vector.load %arg4[%c0_1, %c0_2] : memref<4x32xf32, #tpu.memory_space<vmem>>, vector<4x32xf32>
    %cst = arith.constant dense<0.000000e+00> : vector<64x32xf32>
    %2 = tpu.matmul %0, %1, %cst {dimension_numbers = #tpu.dot_dimension_numbers<[1], [0], [0], [1], [0, 0, 1, 1], [], []>} : vector<64x4xf32>, vector<4x32xf32>, vector<64x32xf32> -> vector<64x32xf32>
    %c0_3 = arith.constant 0 : index
    %c0_4 = arith.constant 0 : index
    %3 = vector.load %arg1[%c0_3, %c0_4] : memref<64x1xf32, #tpu.memory_space<vmem>>, vector<64x1xf32>
    %c0_5 = arith.constant 0 : index
    %c0_6 = arith.constant 0 : index
    %4 = vector.load %arg5[%c0_5, %c0_6] : memref<1x32xf32, #tpu.memory_space<vmem>>, vector<1x32xf32>
    %5 = vector.broadcast %3 : vector<64x1xf32> to vector<64x32xf32>
    %6 = vector.broadcast %4 : vector<1x32xf32> to vector<64x32xf32>
    %7 = arith.mulf %5, %6 : vector<64x32xf32>
    %8 = arith.addf %2, %7 : vector<64x32xf32>
    %c0_7 = arith.constant 0 : index
    %c0_8 = arith.constant 0 : index
    %9 = vector.load %arg6[%c0_7, %c0_8] : memref<1x32xf32, #tpu.memory_space<vmem>>, vector<1x32xf32>
    %10 = vector.broadcast %9 : vector<1x32xf32> to vector<64x32xf32>
    %11 = arith.addf %8, %10 : vector<64x32xf32>
    %c0_9 = arith.constant 0 : index
    %c0_10 = arith.constant 0 : index
    %12 = vector.load %arg12[%c0_9, %c0_10] : memref<64x32xf32, #tpu.memory_space<vmem>>, vector<64x32xf32>
    tpu.vector_store %arg12[%c0_9, %c0_10], %11 {strides = array<i32>} : memref<64x32xf32, #tpu.memory_space<vmem>>, vector<64x32xf32>,
    %c0_11 = arith.constant 0 : index
    %c0_12 = arith.constant 0 : index
    %13 = vector.load %arg7[%c0_11, %c0_12] : memref<32x32xf32, #tpu.memory_space<vmem>>, vector<32x32xf32>
    %c0_13 = arith.constant 0 : index
    %c0_14 = arith.constant 0 : index
    %14 = vector.load %arg3[%c0_13, %c0_14] : memref<8x32xf32, #tpu.memory_space<vmem>>, vector<8x32xf32>
    %c0_i32 = arith.constant 0 : i32
    %c8_i32 = arith.constant 8 : i32
    %15 = arith.muli %c0_i32, %c8_i32 : i32
    %16 = tpu.assume_multiple %15, 8 : i32
    %17 = arith.index_cast %16 : i32 to index
    %c0_15 = arith.constant 0 : index
    %18 = vector.load %arg12[%17, %c0_15] : memref<64x32xf32, #tpu.memory_space<vmem>>, vector<8x32xf32>
    %cst_16 = arith.constant dense<0.000000e+00> : vector<8x32xf32>
    %19 = tpu.matmul %14, %13, %cst_16 {dimension_numbers = #tpu.dot_dimension_numbers<[1], [0], [0], [1], [0, 0, 1, 1], [], []>} : vector<8x32xf32>, vector<32x32xf32>, vector<8x32xf32> -> vector<8x32xf32>
    %20 = arith.addf %18, %19 : vector<8x32xf32>
    %21 = math.tanh %20 : vector<8x32xf32>
    %22 = arith.index_cast %16 : i32 to index
    %c0_17 = arith.constant 0 : index
    %23 = vector.load %arg12[%22, %c0_17] : memref<64x32xf32, #tpu.memory_space<vmem>>, vector<8x32xf32>
    tpu.vector_store %arg12[%22, %c0_17], %21 {strides = array<i32>} : memref<64x32xf32, #tpu.memory_space<vmem>>, vector<8x32xf32>,
    %c1_i32 = arith.constant 1 : i32
    %c8_i32_18 = arith.constant 8 : i32
    %24 = arith.muli %c1_i32, %c8_i32_18 : i32
    %25 = tpu.assume_multiple %24, 8 : i32
    %26 = arith.index_cast %25 : i32 to index
    %c0_19 = arith.constant 0 : index
    %27 = vector.load %arg12[%26, %c0_19] : memref<64x32xf32, #tpu.memory_space<vmem>>, vector<8x32xf32>
    %cst_20 = arith.constant dense<0.000000e+00> : vector<8x32xf32>
    %28 = tpu.matmul %21, %13, %cst_20 {dimension_numbers = #tpu.dot_dimension_numbers<[1], [0], [0], [1], [0, 0, 1, 1], [], []>} : vector<8x32xf32>, vector<32x32xf32>, vector<8x32xf32> -> vector<8x32xf32>
    %29 = arith.addf %27, %28 : vector<8x32xf32>
    %30 = math.tanh %29 : vector<8x32xf32>
    %31 = arith.index_cast %25 : i32 to index
    %c0_21 = arith.constant 0 : index
    %32 = vector.load %arg12[%31, %c0_21] : memref<64x32xf32, #tpu.memory_space<vmem>>, vector<8x32xf32>
    tpu.vector_store %arg12[%31, %c0_21], %30 {strides = array<i32>} : memref<64x32xf32, #tpu.memory_space<vmem>>, vector<8x32xf32>,
    %c2_i32 = arith.constant 2 : i32
    %c8_i32_22 = arith.constant 8 : i32
    %33 = arith.muli %c2_i32, %c8_i32_22 : i32
    %34 = tpu.assume_multiple %33, 8 : i32
    %35 = arith.index_cast %34 : i32 to index
    %c0_23 = arith.constant 0 : index
    %36 = vector.load %arg12[%35, %c0_23] : memref<64x32xf32, #tpu.memory_space<vmem>>, vector<8x32xf32>
    %cst_24 = arith.constant dense<0.000000e+00> : vector<8x32xf32>
    %37 = tpu.matmul %30, %13, %cst_24 {dimension_numbers = #tpu.dot_dimension_numbers<[1], [0], [0], [1], [0, 0, 1, 1], [], []>} : vector<8x32xf32>, vector<32x32xf32>, vector<8x32xf32> -> vector<8x32xf32>
    %38 = arith.addf %36, %37 : vector<8x32xf32>
    %39 = math.tanh %38 : vector<8x32xf32>
    %40 = arith.index_cast %34 : i32 to index
    %c0_25 = arith.constant 0 : index
    %41 = vector.load %arg12[%40, %c0_25] : memref<64x32xf32, #tpu.memory_space<vmem>>, vector<8x32xf32>
    tpu.vector_store %arg12[%40, %c0_25], %39 {strides = array<i32>} : memref<64x32xf32, #tpu.memory_space<vmem>>, vector<8x32xf32>,
    %c3_i32 = arith.constant 3 : i32
    %c8_i32_26 = arith.constant 8 : i32
    %42 = arith.muli %c3_i32, %c8_i32_26 : i32
    %43 = tpu.assume_multiple %42, 8 : i32
    %44 = arith.index_cast %43 : i32 to index
    %c0_27 = arith.constant 0 : index
    %45 = vector.load %arg12[%44, %c0_27] : memref<64x32xf32, #tpu.memory_space<vmem>>, vector<8x32xf32>
    %cst_28 = arith.constant dense<0.000000e+00> : vector<8x32xf32>
    %46 = tpu.matmul %39, %13, %cst_28 {dimension_numbers = #tpu.dot_dimension_numbers<[1], [0], [0], [1], [0, 0, 1, 1], [], []>} : vector<8x32xf32>, vector<32x32xf32>, vector<8x32xf32> -> vector<8x32xf32>
    %47 = arith.addf %45, %46 : vector<8x32xf32>
    %48 = math.tanh %47 : vector<8x32xf32>
    %49 = arith.index_cast %43 : i32 to index
    %c0_29 = arith.constant 0 : index
    %50 = vector.load %arg12[%49, %c0_29] : memref<64x32xf32, #tpu.memory_space<vmem>>, vector<8x32xf32>
    tpu.vector_store %arg12[%49, %c0_29], %48 {strides = array<i32>} : memref<64x32xf32, #tpu.memory_space<vmem>>, vector<8x32xf32>,
    %c4_i32 = arith.constant 4 : i32
    %c8_i32_30 = arith.constant 8 : i32
    %51 = arith.muli %c4_i32, %c8_i32_30 : i32
    %52 = tpu.assume_multiple %51, 8 : i32
    %53 = arith.index_cast %52 : i32 to index
    %c0_31 = arith.constant 0 : index
    %54 = vector.load %arg12[%53, %c0_31] : memref<64x32xf32, #tpu.memory_space<vmem>>, vector<8x32xf32>
    %cst_32 = arith.constant dense<0.000000e+00> : vector<8x32xf32>
    %55 = tpu.matmul %48, %13, %cst_32 {dimension_numbers = #tpu.dot_dimension_numbers<[1], [0], [0], [1], [0, 0, 1, 1], [], []>} : vector<8x32xf32>, vector<32x32xf32>, vector<8x32xf32> -> vector<8x32xf32>
    %56 = arith.addf %54, %55 : vector<8x32xf32>
    %57 = math.tanh %56 : vector<8x32xf32>
    %58 = arith.index_cast %52 : i32 to index
    %c0_33 = arith.constant 0 : index
    %59 = vector.load %arg12[%58, %c0_33] : memref<64x32xf32, #tpu.memory_space<vmem>>, vector<8x32xf32>
    tpu.vector_store %arg12[%58, %c0_33], %57 {strides = array<i32>} : memref<64x32xf32, #tpu.memory_space<vmem>>, vector<8x32xf32>,
    %c5_i32 = arith.constant 5 : i32
    %c8_i32_34 = arith.constant 8 : i32
    %60 = arith.muli %c5_i32, %c8_i32_34 : i32
    %61 = tpu.assume_multiple %60, 8 : i32
    %62 = arith.index_cast %61 : i32 to index
    %c0_35 = arith.constant 0 : index
    %63 = vector.load %arg12[%62, %c0_35] : memref<64x32xf32, #tpu.memory_space<vmem>>, vector<8x32xf32>
    %cst_36 = arith.constant dense<0.000000e+00> : vector<8x32xf32>
    %64 = tpu.matmul %57, %13, %cst_36 {dimension_numbers = #tpu.dot_dimension_numbers<[1], [0], [0], [1], [0, 0, 1, 1], [], []>} : vector<8x32xf32>, vector<32x32xf32>, vector<8x32xf32> -> vector<8x32xf32>
    %65 = arith.addf %63, %64 : vector<8x32xf32>
    %66 = math.tanh %65 : vector<8x32xf32>
    %67 = arith.index_cast %61 : i32 to index
    %c0_37 = arith.constant 0 : index
    %68 = vector.load %arg12[%67, %c0_37] : memref<64x32xf32, #tpu.memory_space<vmem>>, vector<8x32xf32>
    tpu.vector_store %arg12[%67, %c0_37], %66 {strides = array<i32>} : memref<64x32xf32, #tpu.memory_space<vmem>>, vector<8x32xf32>,
    %c6_i32 = arith.constant 6 : i32
    %c8_i32_38 = arith.constant 8 : i32
    %69 = arith.muli %c6_i32, %c8_i32_38 : i32
    %70 = tpu.assume_multiple %69, 8 : i32
    %71 = arith.index_cast %70 : i32 to index
    %c0_39 = arith.constant 0 : index
    %72 = vector.load %arg12[%71, %c0_39] : memref<64x32xf32, #tpu.memory_space<vmem>>, vector<8x32xf32>
    %cst_40 = arith.constant dense<0.000000e+00> : vector<8x32xf32>
    %73 = tpu.matmul %66, %13, %cst_40 {dimension_numbers = #tpu.dot_dimension_numbers<[1], [0], [0], [1], [0, 0, 1, 1], [], []>} : vector<8x32xf32>, vector<32x32xf32>, vector<8x32xf32> -> vector<8x32xf32>
    %74 = arith.addf %72, %73 : vector<8x32xf32>
    %75 = math.tanh %74 : vector<8x32xf32>
    %76 = arith.index_cast %70 : i32 to index
    %c0_41 = arith.constant 0 : index
    %77 = vector.load %arg12[%76, %c0_41] : memref<64x32xf32, #tpu.memory_space<vmem>>, vector<8x32xf32>
    tpu.vector_store %arg12[%76, %c0_41], %75 {strides = array<i32>} : memref<64x32xf32, #tpu.memory_space<vmem>>, vector<8x32xf32>,
    %c7_i32 = arith.constant 7 : i32
    %c8_i32_42 = arith.constant 8 : i32
    %78 = arith.muli %c7_i32, %c8_i32_42 : i32
    %79 = tpu.assume_multiple %78, 8 : i32
    %80 = arith.index_cast %79 : i32 to index
    %c0_43 = arith.constant 0 : index
    %81 = vector.load %arg12[%80, %c0_43] : memref<64x32xf32, #tpu.memory_space<vmem>>, vector<8x32xf32>
    %cst_44 = arith.constant dense<0.000000e+00> : vector<8x32xf32>
    %82 = tpu.matmul %75, %13, %cst_44 {dimension_numbers = #tpu.dot_dimension_numbers<[1], [0], [0], [1], [0, 0, 1, 1], [], []>} : vector<8x32xf32>, vector<32x32xf32>, vector<8x32xf32> -> vector<8x32xf32>
    %83 = arith.addf %81, %82 : vector<8x32xf32>
    %84 = math.tanh %83 : vector<8x32xf32>
    %85 = arith.index_cast %79 : i32 to index
    %c0_45 = arith.constant 0 : index
    %86 = vector.load %arg12[%85, %c0_45] : memref<64x32xf32, #tpu.memory_space<vmem>>, vector<8x32xf32>
    tpu.vector_store %arg12[%85, %c0_45], %84 {strides = array<i32>} : memref<64x32xf32, #tpu.memory_space<vmem>>, vector<8x32xf32>,
    %c8_i32_46 = arith.constant 8 : i32
    %c0_47 = arith.constant 0 : index
    %c0_48 = arith.constant 0 : index
    %87 = vector.load %arg11[%c0_47, %c0_48] : memref<8x32xf32, #tpu.memory_space<vmem>>, vector<8x32xf32>
    tpu.vector_store %arg11[%c0_47, %c0_48], %84 {strides = array<i32>} : memref<8x32xf32, #tpu.memory_space<vmem>>, vector<8x32xf32>,
    %c0_49 = arith.constant 0 : index
    %c0_50 = arith.constant 0 : index
    %88 = vector.load %arg12[%c0_49, %c0_50] : memref<64x32xf32, #tpu.memory_space<vmem>>, vector<64x32xf32>
    %c0_51 = arith.constant 0 : index
    %c0_52 = arith.constant 0 : index
    %89 = vector.load %arg8[%c0_51, %c0_52] : memref<32x128xf32, #tpu.memory_space<vmem>>, vector<32x128xf32>
    %cst_53 = arith.constant dense<0.000000e+00> : vector<64x128xf32>
    %90 = tpu.matmul %88, %89, %cst_53 {dimension_numbers = #tpu.dot_dimension_numbers<[1], [0], [0], [1], [0, 0, 1, 1], [], []>} : vector<64x32xf32>, vector<32x128xf32>, vector<64x128xf32> -> vector<64x128xf32>
    %c0_54 = arith.constant 0 : index
    %c0_55 = arith.constant 0 : index
    %91 = vector.load %arg9[%c0_54, %c0_55] : memref<1x128xf32, #tpu.memory_space<vmem>>, vector<1x128xf32>
    %92 = vector.broadcast %91 : vector<1x128xf32> to vector<64x128xf32>
    %93 = arith.addf %90, %92 : vector<64x128xf32>
    %c0_56 = arith.constant 0 : index
    %c0_57 = arith.constant 0 : index
    %94 = vector.load %arg10[%c0_56, %c0_57] : memref<64x128xf32, #tpu.memory_space<vmem>>, vector<64x128xf32>
    tpu.vector_store %arg10[%c0_56, %c0_57], %93 {strides = array<i32>} : memref<64x128xf32, #tpu.memory_space<vmem>>, vector<64x128xf32>,
    return
  }
  func.func @transform_0(%arg0: i32) -> (i32, i32) {
    %c0_i32 = arith.constant 0 : i32
    %c0_i32_0 = arith.constant 0 : i32
    return %arg0, %c0_i32 : i32, i32
  }
  func.func @transform_1(%arg0: i32) -> (i32, i32) {
    %c0_i32 = arith.constant 0 : i32
    %c0_i32_0 = arith.constant 0 : i32
    return %arg0, %c0_i32 : i32, i32
  }
  func.func @transform_2(%arg0: i32) -> (i32, i32) {
    %c0_i32 = arith.constant 0 : i32
    %c0_i32_0 = arith.constant 0 : i32
    return %arg0, %c0_i32 : i32, i32
  }
  func.func @transform_3(%arg0: i32) -> (i32, i32) {
    %c0_i32 = arith.constant 0 : i32
    %c0_i32_0 = arith.constant 0 : i32
    %c0_i32_1 = arith.constant 0 : i32
    return %c0_i32, %c0_i32_0 : i32, i32
  }
  func.func @transform_4(%arg0: i32) -> (i32, i32) {
    %c0_i32 = arith.constant 0 : i32
    %c0_i32_0 = arith.constant 0 : i32
    %c0_i32_1 = arith.constant 0 : i32
    return %c0_i32, %c0_i32_0 : i32, i32
  }
  func.func @transform_5(%arg0: i32) -> (i32, i32) {
    %c0_i32 = arith.constant 0 : i32
    %c0_i32_0 = arith.constant 0 : i32
    %c0_i32_1 = arith.constant 0 : i32
    return %c0_i32, %c0_i32_0 : i32, i32
  }
  func.func @transform_6(%arg0: i32) -> (i32, i32) {
    %c0_i32 = arith.constant 0 : i32
    %c0_i32_0 = arith.constant 0 : i32
    %c0_i32_1 = arith.constant 0 : i32
    return %c0_i32, %c0_i32_0 : i32, i32
  }
  func.func @transform_7(%arg0: i32) -> (i32, i32) {
    %c0_i32 = arith.constant 0 : i32
    %c0_i32_0 = arith.constant 0 : i32
    %c0_i32_1 = arith.constant 0 : i32
    return %c0_i32, %c0_i32_0 : i32, i32
  }
  func.func @transform_8(%arg0: i32) -> (i32, i32) {
    %c0_i32 = arith.constant 0 : i32
    %c0_i32_0 = arith.constant 0 : i32
    %c0_i32_1 = arith.constant 0 : i32
    return %c0_i32, %c0_i32_0 : i32, i32
  }
  func.func @transform_9(%arg0: i32) -> (i32, i32) {
    %c0_i32 = arith.constant 0 : i32
    %c0_i32_0 = arith.constant 0 : i32
    return %arg0, %c0_i32 : i32, i32
  }
  func.func @transform_10(%arg0: i32) -> (i32, i32) {
    %c0_i32 = arith.constant 0 : i32
    %c0_i32_0 = arith.constant 0 : i32
    return %arg0, %c0_i32 : i32, i32
  }
}

</mosaic_0001>

<bundles_post_ra>
// kernel: rmtpp_forward.1
= control target key start
LH: loop header
LB: loop body
LE: loop exit
PB: predicated region body
PF: predicated region fallthrough
CT: control target
= control target key end

     0   :  { %vm131_vm0 = vcmask 1043456   ;;  %vm106_vm1 = vcmask 31744   ;;  %v1291_v9 = vmov 0.0   ;;  %v1292_v11 = vmov 0   ;;  %s1608_s3 = inlined_call_operand.vmem [shape: f32[4,32], index: 3, kind: input, shape index: {}]   ;;  %s1609_s1 = inlined_call_operand.vmem [shape: f32[64,4], index: 1, kind: input, shape index: {}]   ;;  %s1610_s6 = inlined_call_operand.vmem [shape: f32[32,32], index: 6, kind: input, shape index: {}]   ;;  %s1611_s0 = inlined_call_operand.vmem [shape: f32[64,1], index: 0, kind: input, shape index: {}]   ;;  %s1612_s2 = inlined_call_operand.vmem [shape: f32[8,32], index: 2, kind: input, shape index: {}]   ;;  %s1613_s4 = inlined_call_operand.vmem [shape: f32[1,32], index: 4, kind: input, shape index: {}]   ;;  %s1614_s5 = inlined_call_operand.vmem [shape: f32[1,32], index: 5, kind: input, shape index: {}]   ;;  %s1615_s7 = inlined_call_operand.vmem [shape: f32[32,128], index: 7, kind: input, shape index: {}]   ;;  %s1616_s8 = inlined_call_operand.vmem [shape: f32[1,128], index: 8, kind: input, shape index: {}]   ;;  %s1617_s9 = inlined_call_operand.vmem [shape: f32[64,128], index: 9, kind: output, shape index: {0}]   ;;  %s1618_s10 = inlined_call_operand.vmem [shape: f32[8,32], index: 10, kind: output, shape index: {1}]  }
   0x1   :  { %v42_v0 = vld [vmem:[%s1608_s3] sm:$0xf]  ;;  %v35_v3 = vld [vmem:[%s1609_s1 + $0x8] sm:$0xff]  ;;  %v40_v5 = vld [vmem:[%s1609_s1 + $0x30] sm:$0xff]  ;;  %1273 = vset.pattern.permute.xlu0 %v1292_v11  ;;  %1274 = vset.pattern.permute.xlu1 %v1292_v11  ;;  %vm1293_vm2 = vmmov 0   ;;  %vm255_vm3 = vcmask 261120  }
   0x2   :  { %v34_v1 = vld [vmem:[%s1609_s1] sm:$0xff]  ;;  %1146 = vmatprep.subr.msk.mxu0 %vm131_vm0, %v42_v0  ;;  %1268 = vmatprep.subr.msk.mxu1 %vm131_vm0, %v42_v0  ;;  %v39_v4 = vld [vmem:[%s1609_s1 + $0x28] sm:$0xff]  ;;  %v1372_v6 = vld [vmem:[%s1610_s6 + $0x18] sm:$0xff] }
   0x3   :  { %v38_v2 = vld [vmem:[%s1609_s1 + $0x20] sm:$0xff]  ;;  %1147 = vmatpush3.msk.msra.mxu0 %vm131_vm0, %v42_v0  ;;  %1269 = vmatpush3.msk.msra.mxu1 %vm131_vm0, %v42_v0  ;;  %v41_v8 = vld [vmem:[%s1609_s1 + $0x38] sm:$0xff]  ;;  %v1388_v10 = vld [vmem:[%s1610_s6 + $0x10] sm:$0xff] }
   0x4   :  { %1148 = vmatprep.mubr.msk.f32.mxu0 %vm106_vm1, %v34_v1  ;;  %1154 = vmatprep.mubr.msk.f32.mxu1 %vm106_vm1, %v38_v2  ;;  %v43_v7 = vld [vmem:[%s1611_s0] sm:$0xff]  ;;  %v45_v12 = vld [vmem:[%s1611_s0 + $0x10] sm:$0xff]  ;;  %v1398_v13 = vld [vmem:[%s1610_s6 + $0x8] sm:$0xff] }
   0x5   :  { %1149 = vmatmul.mubr.msk.f32.vlgmr.msra.gmra.mxu0 %vm106_vm1, %v35_v3  ;;  %1155 = vmatmul.mubr.msk.f32.vlgmr.msra.gmra.mxu1 %vm106_vm1, %v39_v4  ;;  %v44_v14 = vld [vmem:[%s1611_s0 + $0x8] sm:$0xff]  ;;  %v1410_v15 = vld [vmem:[%s1610_s6] sm:$0xff]  ;;  %v46_v17 = vld [vmem:[%s1611_s0 + $0x18] sm:$0xff] }
   0x6   :  { %1157 = vmatprep.mubr.msk.f32.mxu1 %vm106_vm1, %v40_v5  ;;  %1160 = vmatprep.subr.mxu1 %v1291_v9  ;;  %v268_v16 = vld [vmem:[%s1612_s2] sm:$0xff]  ;;  %v48_v19 = vld [vmem:[%s1611_s0 + $0x28] sm:$0xff]  ;;  %v49_v20 = vld [vmem:[%s1611_s0 + $0x30] sm:$0xff] }
   0x7   :  { %1161 = vmatpush3.msra.mxu1 %v1372_v6  ;;  %54 = vperm.xlu0 %1273, %v43_v7   ;;  %v47_v18 = vld [vmem:[%s1611_s0 + $0x20] sm:$0xff]  ;;  %v50_v21 = vld [vmem:[%s1611_s0 + $0x38] sm:$0xff]  ;;  %v36_v22 = vld [vmem:[%s1609_s1 + $0x10] sm:$0xff] }
   0x8   :  { %1162 = vmatprep.subr.mxu1 %v1291_v9  ;;  %64 = vperm.xlu1 %1274, %v45_v12   ;;  %v1057_v23 = vld [vmem:[%s1613_s4] ss:$0 sm:$0xff]  ;;  %v37_v0 = vld [vmem:[%s1609_s1 + $0x18] sm:$0xff] }
   0x9   :  { %1158 = vmatmul.mubr.msk.f32.gmra.mxu1 %vm106_vm1, %v41_v8  ;;  %1182 = vmatprep.subr.mxu0 %v1291_v9  ;;  %v1468_v38 = vld [vmem:[%s1614_s5] ss:$0 sm:$0xff] }
   0xa   :  { %1163 = vmatpush3.msra.mxu1 %v1388_v10  ;;  %1168 = vmatprep.mubr.msk.f32.mxu1 %vm1293_vm2, %v1291_v9 }
   0xb   :  { %1164 = vmatprep.subr.mxu1 %v1291_v9  ;;  %59 = vperm.xlu0 %1273, %v44_v14  }
   0xc   :  { %1165 = vmatpush3.msra.mxu1 %v1398_v13  ;;  %1183 = vmatpush3.msra.mxu0 %v1372_v6 }
   0xd   :  { %1166 = vmatprep.subr.mxu1 %v1291_v9  ;;  %69 = vperm.xlu1 %1274, %v46_v17  }
   0xe   :  { %1167 = vmatpush3.msra.mxu1 %v1410_v15  ;;  %1184 = vmatprep.subr.mxu0 %v1291_v9 }
   0xf   :  { %1169 = vmatmul.mubr.msk.f32.vlgmr.msra.gmra.mxu1 %vm255_vm3, %v268_v16  ;;  %74 = vperm.xlu0 %1273, %v47_v18  }
  0x10   :  { %1171 = vmatprep.subr.mxu1 %v1291_v9  ;;  %1179 = vmatprep.mubr.msk.f32.mxu1 %vm1293_vm2, %v1291_v9 }
  0x11   :  { %1172 = vmatpush3.msra.mxu1 %v1372_v6  ;;  %79 = vperm.xlu1 %1274, %v48_v19  }
  0x12   :  { %1173 = vmatprep.subr.mxu1 %v1291_v9  ;;  %1185 = vmatpush3.msra.mxu0 %v1388_v10 }
  0x13   :  { %1174 = vmatpush3.msra.mxu1 %v1388_v10  ;;  %84 = vperm.xlu0 %1273, %v49_v20  }
  0x14   :  { %1175 = vmatprep.subr.mxu1 %v1291_v9  ;;  %1186 = vmatprep.subr.mxu0 %v1291_v9 }
  0x15   :  { %1176 = vmatpush3.msra.mxu1 %v1398_v13  ;;  %89 = vperm.xlu1 %1274, %v50_v21  }
  0x16   :  { %1177 = vmatprep.subr.mxu1 %v1291_v9  ;;  %1187 = vmatpush3.msra.mxu0 %v1398_v13 }
  0x17   :  { %1178 = vmatpush3.msra.mxu1 %v1410_v15  ;;  %1188 = vmatprep.subr.mxu0 %v1291_v9 }
  0x18   :  { %1193 = vmatprep.subr.mxu1 %v1291_v9  ;;  %1189 = vmatpush3.msra.mxu0 %v1410_v15 }
  0x19   :  { %1204 = vmatprep.subr.mxu0 %v1291_v9  ;;  %1151 = vmatprep.mubr.msk.f32.mxu0 %vm106_vm1, %v36_v22 }
  0x1a   :  { %1152 = vmatmul.mubr.msk.f32.gmra.mxu0 %vm106_vm1, %v37_v0 }
  0x1b   :  { %1190 = vmatprep.mubr.msk.f32.mxu0 %vm1293_vm2, %v1291_v9 }
  0x82   :  { %v55_v28 = vpop.permute.xlu0 %54 }
  0x83   :  { %v65_v24 = vpop.permute.xlu1 %64  ;;  %v98_v35 = vmul.f32 %v1057_v23, %v55_v28 }
  0x84   :  { %v1461_v25 = vmul.f32 %v1057_v23, %v65_v24 }
  0x86   :  { %v60_v29 = vpop.permute.xlu0 %59 }
  0x87   :  { %v99_v32 = vmul.f32 %v1057_v23, %v60_v29 }
  0x88   :  { %v70_v26 = vpop.permute.xlu1 %69 }
  0x89   :  { %v1463_v27 = vmul.f32 %v1057_v23, %v70_v26 }
  0x8a   :  { %v75_v31 = vpop.permute.xlu0 %74 }
  0x8b   :  { %v102_v36 = vmul.f32 %v1057_v23, %v75_v31 }
  0x8c   :  { %v80_v30 = vpop.permute.xlu1 %79 }
  0x8d   :  { %v103_v33 = vmul.f32 %v1057_v23, %v80_v30 }
  0x8e   :  { %v85_v41 = vpop.permute.xlu0 %84 }
  0x8f   :  { %v104_v51 = vmul.f32 %v1057_v23, %v85_v41 }
  0x90   :  { %v90_v34 = vpop.permute.xlu1 %89 }
  0x91   :  { %v105_v43 = vmul.f32 %v1057_v23, %v90_v34 }
  0xc5   :  { %v1150_v37 = vpop.f32.mrf.mxu0  ;;  %v1156_v39 = vpop.f32.mrf.mxu1 }
  0xc6   :  { %v207_v40 = vadd.f32 %v1150_v37, %v99_v32  ;;  %v227_v42 = vadd.f32 %v1156_v39, %v103_v33  ;;  %v904_v32 = vld [vmem:[%s1615_s7 + $0x18] sm:$0xff] }
  0xc7   :  { %v201_v44 = vpop.f32.mrf.mxu0  ;;  %v221_v45 = vpop.f32.mrf.mxu1 }
  0xc8   :  { %v248_v46 = vadd.f32 %v1468_v38, %v207_v40  ;;  %v202_v47 = vadd.f32 %v201_v44, %v98_v35  ;;  %v222_v48 = vadd.f32 %v221_v45, %v102_v36  ;;  %v252_v49 = vadd.f32 %v1468_v38, %v227_v42 }
  0xc9   :  { %v1159_v50 = vpop.f32.mrf.mxu1 }
  0xca   :  { %257 = vst.msk [vmem:[#allocation2 + $0x8] sm:$0xff] %vm255_vm3, %v248_v46  ;;  %v247_v52 = vadd.f32 %v1468_v38, %v202_v47  ;;  %v251_v53 = vadd.f32 %v1468_v38, %v222_v48  ;;  %261 = vst.msk [vmem:[#allocation2 + $0x28] sm:$0xff] %vm255_vm3, %v252_v49  ;;  %v237_v54 = vadd.f32 %v1159_v50, %v105_v43  ;;  %v1076_v46 = vld [vmem:[%s1616_s8] ss:$0 sm:$0xff] }
  0xcb   :  { %v231_v55 = vpop.f32.mrf.mxu1 }
  0xcc   :  { %256 = vst.msk [vmem:[#allocation2] sm:$0xff] %vm255_vm3, %v247_v52  ;;  %260 = vst.msk [vmem:[#allocation2 + $0x20] sm:$0xff] %vm255_vm3, %v251_v53  ;;  %v232_v56 = vadd.f32 %v231_v55, %v104_v51  ;;  %v254_v57 = vadd.f32 %v1468_v38, %v237_v54 }
  0xce   :  { %v253_v58 = vadd.f32 %v1468_v38, %v232_v56  ;;  %263 = vst.msk [vmem:[#allocation2 + $0x38] sm:$0xff] %vm255_vm3, %v254_v57 }
  0xcf   :  { %v339_v59 = vpop.f32.mrf.mxu1 }
  0xd0   :  { %262 = vst.msk [vmem:[#allocation2 + $0x30] sm:$0xff] %vm255_vm3, %v253_v58 }
  0xd1   :  { %v1170_v60 = vpop.f32.mrf.mxu1  ;;  %v347_v1 = vld [vmem:[#allocation2 + $0x8] sm:$0xff] }
  0xd3   :  { %v269_v61 = vld [vmem:[#allocation2] sm:$0xff] }
  0xd4   :  { %v343_v62 = vadd.f32 %v339_v59, %v269_v61 }
  0xd5   :  { %v815_v61 = vld [vmem:[#allocation2 + $0x38] sm:$0xff] }
  0xd6   :  { %1275 = vtanh.f32 %v343_v62 }
  0xd7   :  { %v737_v42 = vld [vmem:[#allocation2 + $0x30] sm:$0xff] }
  0xda   :  { %v1153_v7 = vpop.f32.mrf.mxu0 }
  0xdb   :  { %v217_v8 = vadd.f32 %v1153_v7, %v1463_v27  ;;  %v581_v27 = vld [vmem:[#allocation2 + $0x20] sm:$0xff] }
  0xdc   :  { %v211_v11 = vpop.f32.mrf.mxu0 }
  0xdd   :  { %v250_v12 = vadd.f32 %v1468_v38, %v217_v8  ;;  %v212_v14 = vadd.f32 %v211_v11, %v1461_v25 }
  0xdf   :  { %259 = vst.msk [vmem:[#allocation2 + $0x18] sm:$0xff] %vm255_vm3, %v250_v12  ;;  %v249_v16 = vadd.f32 %v1468_v38, %v212_v14 }
  0xe1   :  { %258 = vst.msk [vmem:[#allocation2 + $0x10] sm:$0xff] %vm255_vm3, %v249_v16 }
  0xe3   :  { %v1276_v63 = vpop.eup %1275 }
  0xe4   :  { %345 = vst.msk [vmem:[#allocation2] sm:$0xff] %vm255_vm3, %v1276_v63  ;;  %1180 = vmatmul.mubr.msk.f32.vlgmr.msra.gmra.mxu1 %vm255_vm3, %v1276_v63 }
  0xe5   :  { %1194 = vmatpush3.msra.mxu1 %v1372_v6  ;;  %1201 = vmatprep.mubr.msk.f32.mxu1 %vm1293_vm2, %v1291_v9 }
  0xe6   :  { %1195 = vmatprep.subr.mxu1 %v1291_v9  ;;  %v503_v22 = vld [vmem:[#allocation2 + $0x18] sm:$0xff] }
  0xe7   :  { %1196 = vmatpush3.msra.mxu1 %v1388_v10 }
  0xe8   :  { %1197 = vmatprep.subr.mxu1 %v1291_v9  ;;  %v425_v17 = vld [vmem:[#allocation2 + $0x10] sm:$0xff] }
  0xe9   :  { %1198 = vmatpush3.msra.mxu1 %v1398_v13 }
  0xea   :  { %1199 = vmatprep.subr.mxu1 %v1291_v9 }
  0xeb   :  { %1200 = vmatpush3.msra.mxu1 %v1410_v15 }
  0xec   :  { %1215 = vmatprep.subr.mxu1 %v1291_v9 }
 0x1a4   :  { %v417_v2 = vpop.f32.mrf.mxu1 }
 0x1a5   :  { %v421_v3 = vadd.f32 %v417_v2, %v347_v1 }
 0x1a6   :  { %v1181_v4 = vpop.f32.mrf.mxu1 }
 0x1a7   :  { %1277 = vtanh.f32 %v421_v3 }
 0x1b4   :  { %v1278_v5 = vpop.eup %1277 }
 0x1b5   :  { %423 = vst.msk [vmem:[#allocation2 + $0x8] sm:$0xff] %vm255_vm3, %v1278_v5  ;;  %1191 = vmatmul.mubr.msk.f32.vlgmr.msra.gmra.mxu0 %vm255_vm3, %v1278_v5 }
 0x1b6   :  { %1205 = vmatpush3.msra.mxu0 %v1372_v6  ;;  %1212 = vmatprep.mubr.msk.f32.mxu0 %vm1293_vm2, %v1291_v9 }
 0x1b7   :  { %1206 = vmatprep.subr.mxu0 %v1291_v9 }
 0x1b8   :  { %1207 = vmatpush3.msra.mxu0 %v1388_v10 }
 0x1b9   :  { %1208 = vmatprep.subr.mxu0 %v1291_v9 }
 0x1ba   :  { %1209 = vmatpush3.msra.mxu0 %v1398_v13 }
 0x1bb   :  { %1210 = vmatprep.subr.mxu0 %v1291_v9 }
 0x1bc   :  { %1211 = vmatpush3.msra.mxu0 %v1410_v15  ;;  %v894_v37 = vld [vmem:[#allocation2 + $0x8] sm:$0xff] }
 0x1bd   :  { %1226 = vmatprep.subr.mxu0 %v1291_v9 }
 0x275   :  { %v495_v18 = vpop.f32.mrf.mxu0 }
 0x276   :  { %v499_v19 = vadd.f32 %v495_v18, %v425_v17 }
 0x277   :  { %v1192_v20 = vpop.f32.mrf.mxu0 }
 0x278   :  { %1279 = vtanh.f32 %v499_v19 }
 0x285   :  { %v1280_v21 = vpop.eup %1279 }
 0x286   :  { %501 = vst.msk [vmem:[#allocation2 + $0x10] sm:$0xff] %vm255_vm3, %v1280_v21  ;;  %1202 = vmatmul.mubr.msk.f32.vlgmr.msra.gmra.mxu1 %vm255_vm3, %v1280_v21 }
 0x287   :  { %1216 = vmatpush3.msra.mxu1 %v1372_v6  ;;  %1223 = vmatprep.mubr.msk.f32.mxu1 %vm1293_vm2, %v1291_v9 }
 0x288   :  { %1217 = vmatprep.subr.mxu1 %v1291_v9 }
 0x289   :  { %1218 = vmatpush3.msra.mxu1 %v1388_v10 }
 0x28a   :  { %1219 = vmatprep.subr.mxu1 %v1291_v9 }
 0x28b   :  { %1220 = vmatpush3.msra.mxu1 %v1398_v13 }
 0x28c   :  { %1221 = vmatprep.subr.mxu1 %v1291_v9 }
 0x28d   :  { %1222 = vmatpush3.msra.mxu1 %v1410_v15  ;;  %v895_v38 = vld [vmem:[#allocation2 + $0x10] sm:$0xff] }
 0x28e   :  { %1237 = vmatprep.subr.mxu1 %v1291_v9 }
 0x346   :  { %v573_v23 = vpop.f32.mrf.mxu1 }
 0x347   :  { %v577_v24 = vadd.f32 %v573_v23, %v503_v22 }
 0x348   :  { %v1203_v25 = vpop.f32.mrf.mxu1 }
 0x349   :  { %1281 = vtanh.f32 %v577_v24 }
 0x356   :  { %v1282_v26 = vpop.eup %1281 }
 0x357   :  { %579 = vst.msk [vmem:[#allocation2 + $0x18] sm:$0xff] %vm255_vm3, %v1282_v26  ;;  %1213 = vmatmul.mubr.msk.f32.vlgmr.msra.gmra.mxu0 %vm255_vm3, %v1282_v26 }
 0x358   :  { %1227 = vmatpush3.msra.mxu0 %v1372_v6  ;;  %1234 = vmatprep.mubr.msk.f32.mxu0 %vm1293_vm2, %v1291_v9 }
 0x359   :  { %1228 = vmatprep.subr.mxu0 %v1291_v9 }
 0x35a   :  { %1229 = vmatpush3.msra.mxu0 %v1388_v10 }
 0x35b   :  { %1230 = vmatprep.subr.mxu0 %v1291_v9 }
 0x35c   :  { %1231 = vmatpush3.msra.mxu0 %v1398_v13 }
 0x35d   :  { %1232 = vmatprep.subr.mxu0 %v1291_v9 }
 0x35e   :  { %1233 = vmatpush3.msra.mxu0 %v1410_v15  ;;  %v896_v39 = vld [vmem:[#allocation2 + $0x18] sm:$0xff] }
 0x35f   :  { %1248 = vmatprep.subr.mxu0 %v904_v32 }
 0x417   :  { %v651_v28 = vpop.f32.mrf.mxu0 }
 0x418   :  { %v655_v29 = vadd.f32 %v651_v28, %v581_v27 }
 0x419   :  { %v1214_v30 = vpop.f32.mrf.mxu0 }
 0x41a   :  { %1283 = vtanh.f32 %v655_v29 }
 0x427   :  { %v1284_v31 = vpop.eup %1283 }
 0x428   :  { %657 = vst.msk [vmem:[#allocation2 + $0x20] sm:$0xff] %vm255_vm3, %v1284_v31  ;;  %1224 = vmatmul.mubr.msk.f32.vlgmr.msra.gmra.mxu1 %vm255_vm3, %v1284_v31 }
 0x429   :  { %1238 = vmatpush3.msra.mxu1 %v1372_v6  ;;  %1245 = vmatprep.mubr.msk.f32.mxu1 %vm1293_vm2, %v1291_v9  ;;  %v659_v6 = vld [vmem:[#allocation2 + $0x28] sm:$0xff] }
 0x42a   :  { %1239 = vmatprep.subr.mxu1 %v1291_v9 }
 0x42b   :  { %1240 = vmatpush3.msra.mxu1 %v1388_v10  ;;  %v903_v10 = vld [vmem:[%s1615_s7 + $0x10] sm:$0xff] }
 0x42c   :  { %1241 = vmatprep.subr.mxu1 %v1291_v9 }
 0x42d   :  { %1242 = vmatpush3.msra.mxu1 %v1398_v13  ;;  %v902_v13 = vld [vmem:[%s1615_s7 + $0x8] sm:$0xff] }
 0x42e   :  { %1243 = vmatprep.subr.mxu1 %v1291_v9  ;;  %v893_v9 = vld [vmem:[#allocation2] sm:$0xff] }
 0x42f   :  { %1244 = vmatpush3.msra.mxu1 %v1410_v15  ;;  %v901_v15 = vld [vmem:[%s1615_s7] sm:$0xff] }
 0x430   :  { %v897_v40 = vld [vmem:[#allocation2 + $0x20] sm:$0xff] }
 0x4e8   :  { %v729_v33 = vpop.f32.mrf.mxu1 }
 0x4e9   :  { %v733_v34 = vadd.f32 %v729_v33, %v659_v6 }
 0x4ea   :  { %v1225_v35 = vpop.f32.mrf.mxu1 }
 0x4eb   :  { %1285 = vtanh.f32 %v733_v34 }
 0x4f8   :  { %v1286_v36 = vpop.eup %1285 }
 0x4f9   :  { %735 = vst.msk [vmem:[#allocation2 + $0x28] sm:$0xff] %vm255_vm3, %v1286_v36  ;;  %1235 = vmatmul.mubr.msk.f32.vlgmr.msra.gmra.mxu0 %vm255_vm3, %v1286_v36 }
 0x4fa   :  { %1249 = vmatpush3.msra.mxu0 %v904_v32  ;;  %1256 = vmatprep.mubr.msk.f32.mxu0 %vm255_vm3, %v893_v9 }
 0x4fb   :  { %1250 = vmatprep.subr.mxu0 %v903_v10 }
 0x4fc   :  { %1251 = vmatpush3.msra.mxu0 %v903_v10 }
 0x4fd   :  { %1252 = vmatprep.subr.mxu0 %v902_v13 }
 0x4fe   :  { %1253 = vmatpush3.msra.mxu0 %v902_v13 }
 0x4ff   :  { %1254 = vmatprep.subr.mxu0 %v901_v15 }
 0x500   :  { %1255 = vmatpush3.msra.mxu0 %v901_v15  ;;  %v898_v41 = vld [vmem:[#allocation2 + $0x28] sm:$0xff] }
 0x501   :  { %1257 = vmatmul.mubr.msk.f32.vlgmr.msra.gmra.mxu0 %vm255_vm3, %v894_v37 }
 0x502   :  { %1259 = vmatprep.mubr.msk.f32.mxu0 %vm255_vm3, %v895_v38 }
 0x505   :  { %1260 = vmatmul.mubr.msk.f32.gmra.mxu0 %vm255_vm3, %v896_v39 }
 0x506   :  { %1262 = vmatprep.mubr.msk.f32.mxu0 %vm255_vm3, %v897_v40 }
 0x509   :  { %1263 = vmatmul.mubr.msk.f32.gmra.mxu0 %vm255_vm3, %v898_v41 }
 0x5b9   :  { %v807_v43 = vpop.f32.mrf.mxu0 }
 0x5ba   :  { %v811_v44 = vadd.f32 %v807_v43, %v737_v42 }
 0x5bb   :  { %v1236_v45 = vpop.f32.mrf.mxu0 }
 0x5bc   :  { %1287 = vtanh.f32 %v811_v44 }
 0x5c1   :  { %v1258_v47 = vpop.f32.mrf.mxu0 }
 0x5c2   :  { %v1008_v48 = vadd.f32 %v1258_v47, %v1076_v46 }
 0x5c3   :  { %v1002_v49 = vpop.f32.mrf.mxu0 }
 0x5c4   :  { %1042 = vst [vmem:[%s1617_s9 + $0x8] sm:$0xff] %v1008_v48  ;;  %v1003_v50 = vadd.f32 %v1076_v46, %v1002_v49 }
 0x5c5   :  { %v1261_v51 = vpop.f32.mrf.mxu0 }
 0x5c6   :  { %1041 = vst [vmem:[%s1617_s9] sm:$0xff] %v1003_v50  ;;  %v1018_v52 = vadd.f32 %v1261_v51, %v1076_v46 }
 0x5c7   :  { %v1012_v53 = vpop.f32.mrf.mxu0 }
 0x5c8   :  { %1044 = vst [vmem:[%s1617_s9 + $0x18] sm:$0xff] %v1018_v52  ;;  %v1013_v54 = vadd.f32 %v1076_v46, %v1012_v53 }
 0x5c9   :  { %v1288_v55 = vpop.eup %1287  ;;  %v1264_v56 = vpop.f32.mrf.mxu0 }
 0x5ca   :  { %813 = vst.msk [vmem:[#allocation2 + $0x30] sm:$0xff] %vm255_vm3, %v1288_v55  ;;  %1043 = vst [vmem:[%s1617_s9 + $0x10] sm:$0xff] %v1013_v54  ;;  %v1028_v57 = vadd.f32 %v1264_v56, %v1076_v46  ;;  %1246 = vmatmul.mubr.msk.f32.vlgmr.msra.gmra.mxu1 %vm255_vm3, %v1288_v55 }
 0x5cb   :  { %v1022_v58 = vpop.f32.mrf.mxu0 }
 0x5cc   :  { %1046 = vst [vmem:[%s1617_s9 + $0x28] sm:$0xff] %v1028_v57  ;;  %v1023_v59 = vadd.f32 %v1076_v46, %v1022_v58 }
 0x5ce   :  { %1045 = vst [vmem:[%s1617_s9 + $0x20] sm:$0xff] %v1023_v59 }
 0x5d1   :  { %v899_v60 = vld [vmem:[#allocation2 + $0x30] sm:$0xff] }
 0x5d2   :  { %1265 = vmatprep.mubr.msk.f32.mxu0 %vm255_vm3, %v899_v60 }
 0x68a   :  { %v885_v62 = vpop.f32.mrf.mxu1 }
 0x68b   :  { %v889_v63 = vadd.f32 %v885_v62, %v815_v61 }
 0x68c   :  { %v1247_v0 = vpop.f32.mrf.mxu1 }
 0x68d   :  { %1289 = vtanh.f32 %v889_v63 }
 0x69a   :  { %v1290_v1 = vpop.eup %1289 }
 0x69b   :  { %891 = vst.msk [vmem:[#allocation2 + $0x38] sm:$0xff] %vm255_vm3, %v1290_v1  ;;  %892 = vst.msk [vmem:[%s1618_s10] sm:$0xff] %vm255_vm3, %v1290_v1 }
 0x6a2   :  { %v900_v2 = vld [vmem:[#allocation2 + $0x38] sm:$0xff] }
 0x6a3   :  { %1266 = vmatmul.mubr.msk.f32.gmra.mxu0 %vm255_vm3, %v900_v2 }
 0x763   :  { %v1267_v3 = vpop.f32.mrf.mxu0 }
 0x764   :  { %v1038_v4 = vadd.f32 %v1267_v3, %v1076_v46 }
 0x765   :  { %v1032_v5 = vpop.f32.mrf.mxu0 }
 0x766   :  { %1048 = vst [vmem:[%s1617_s9 + $0x38] sm:$0xff] %v1038_v4  ;;  %v1033_v7 = vadd.f32 %v1076_v46, %v1032_v5 }
 0x768   :  { %1047 = vst [vmem:[%s1617_s9 + $0x30] sm:$0xff] %v1033_v7 }

</bundles_post_ra>
